<compile_context>
chip_gen: v5e
topology: v5e:2x2
jax: 0.10.0
libtpu: 0.0.40
codegen_flags: <defaults>
</compile_context>

<pallas_src>
import numpy as np
import jax
import jax.numpy as jnp
from jax.experimental import pallas as pl
from jax.experimental.pallas import tpu as pltpu


def _round_up(x, m):
    return ((x + m - 1) // m) * m


def _pick_feature_tile(total, cap=512):
    """Largest (8,128)-aligned tile <= cap that evenly divides `total`.

    `total` is always a positive multiple of 128, so 128 always divides."""
    for t in (cap, 384, 256, 128):
        if t <= total and total % t == 0:
            return t
    return total


def cholesky_fwd_kernel(x_ref, lt_ref, bias_ref, out_ref):
    # out tile is resident across the K axis (its index_map ignores k), so it
    # doubles as the f32 accumulator: init with bias at k==0, then accumulate.
    @pl.when(pl.program_id(2) == 0)
    def _():
        out_ref[...] = jnp.broadcast_to(bias_ref[...], out_ref.shape)

    out_ref[...] += jnp.dot(
        x_ref[...], lt_ref[...], preferred_element_type=jnp.float32
    )


def cholesky_forward(x, lower, bias, diag, *, batch_tile=256, feature_tile=512):
    """x: (B, F), lower: (F, F) lower-triangular, bias: (F,), diag: (F,) (>0).

    Returns (outputs (B, F) f32, logabsdet (B,) f32) matching Choleksy.forward.
    """
    B, F = x.shape

    # --- padding for lane-dense, (8,128)-aligned tiles -----------------------
    F_pad = max(_round_up(F, 128), 128)
    TB = min(_round_up(B, 8), batch_tile)
    B_pad = _round_up(B, TB)
    TN = _pick_feature_tile(F_pad, feature_tile)   # output-feature tile
    TK = _pick_feature_tile(F_pad, feature_tile)   # reduce-feature tile

    # Pre-transpose L once (static parameter): F.linear(x, L, b) = x @ L.T + b.
    Lt = lower.astype(jnp.float32).T
    Lt_pad = jnp.zeros((F_pad, F_pad), jnp.float32).at[:F, :F].set(Lt)
    bias_pad = jnp.zeros((1, F_pad), jnp.float32).at[0, :F].set(
        bias.astype(jnp.float32))
    x_pad = jnp.zeros((B_pad, F_pad), jnp.float32).at[:B, :F].set(
        x.astype(jnp.float32))

    grid = (B_pad // TB, F_pad // TN, F_pad // TK)

    out_pad = pl.pallas_call(
        cholesky_fwd_kernel,
        out_shape=jax.ShapeDtypeStruct((B_pad, F_pad), jnp.float32),
        grid=grid,
        in_specs=[
            pl.BlockSpec((TB, TK), lambda i, j, k: (i, k)),   # x: (batch, K) tile
            pl.BlockSpec((TK, TN), lambda i, j, k: (k, j)),   # L^T: (K, N) tile
            pl.BlockSpec((1, TN), lambda i, j, k: (0, j)),    # bias: (1, N) tile
        ],
        out_specs=pl.BlockSpec((TB, TN), lambda i, j, k: (i, j)),  # acc tile
        compiler_params=pltpu.CompilerParams(
            dimension_semantics=("parallel", "parallel", "arbitrary"),
        ),
        cost_estimate=pl.CostEstimate(
            flops=2 * B_pad * F_pad * F_pad,
            transcendentals=0,
            bytes_accessed=4 * (2 * B_pad * F_pad + F_pad * F_pad + F_pad),
        ),
    )(x_pad, Lt_pad, bias_pad)

    out = out_pad[:B, :F]

    # logabsdet = sum(log(diag)) broadcast to (B,) — cheap O(F) reduction done
    # in plain JAX (keeps the kernel output lane-dense, no (B,1) masked stores).
    logabsdet = jnp.sum(jnp.log(diag.astype(jnp.float32))) * jnp.ones(
        (B,), jnp.float32)
    return out, logabsdet


def build_params(features, identity_init=True, eps=0.001, key=None):
    """Deterministic parameter construction mirroring Choleksy.__init__/_initialize."""
    n_tri = (features - 1) * features // 2
    bias = jnp.zeros((features,), jnp.float32)
    if identity_init:
        lower_entries = jnp.zeros((n_tri,), jnp.float32)
        constant = float(np.log(np.exp(1.0 - eps) - 1.0))
        unconstrained_diag = jnp.full((features,), constant, jnp.float32)
    else:
        stdv = 1.0 / np.sqrt(features)
        k1, k2 = jax.random.split(key)
        lower_entries = jax.random.uniform(k1, (n_tri,), jnp.float32, -stdv, stdv)
        unconstrained_diag = jax.random.uniform(k2, (features,), jnp.float32, -stdv, stdv)
    return bias, lower_entries, unconstrained_diag


def assemble_lower(features, lower_entries, unconstrained_diag, eps=0.001):
    """Glue (plain JAX): build the lower-triangular matrix and the constrained diag."""
    diag = jax.nn.softplus(unconstrained_diag) + eps
    tril_r, tril_c = np.tril_indices(features, k=-1)
    L = jnp.zeros((features, features), jnp.float32)
    L = L.at[tril_r, tril_c].set(lower_entries)
    L = L.at[jnp.arange(features), jnp.arange(features)].set(diag)
    return L, diag


if __name__ == "__main__":
    key = jax.random.PRNGKey(0)
    batch, features = 8, 32
    eps = 0.001

    # use non-identity init so the matmul is non-trivial
    kx, kp = jax.random.split(key)
    bias, lower_entries, unconstrained_diag = build_params(
        features, identity_init=False, eps=eps, key=kp
    )
    L, diag = assemble_lower(features, lower_entries, unconstrained_diag, eps=eps)

    x = jax.random.normal(kx, (batch, features), jnp.float32)

    out, logabsdet = cholesky_forward(x, L, bias, diag)
    out = jax.block_until_ready(out)
    logabsdet = jax.block_until_ready(logabsdet)

    # reference check in plain JAX
    ref_out = x @ L.T + bias
    ref_logdet = jnp.sum(jnp.log(diag)) * jnp.ones((batch,), jnp.float32)
    assert out.shape == (batch, features)
    assert logabsdet.shape == (batch,)
    assert jnp.allclose(out, ref_out, atol=1e-5, rtol=1e-5)
    assert jnp.allclose(logabsdet, ref_logdet, atol=1e-5, rtol=1e-5)

    print("KERNEL_OK")
</pallas_src>

<mosaic_0001>
module attributes {stable_mosaic.version = 11 : i64} {
  func.func @cholesky_fwd_kernel(%arg0: i32, %arg1: i32, %arg2: i32, %arg3: memref<8x128xf32, #tpu.memory_space<vmem>>, %arg4: memref<128x128xf32, #tpu.memory_space<vmem>>, %arg5: memref<1x128xf32, #tpu.memory_space<vmem>>, %arg6: memref<8x128xf32, #tpu.memory_space<vmem>>) attributes {dimension_semantics = [#tpu.dimension_semantics<parallel>, #tpu.dimension_semantics<parallel>, #tpu.dimension_semantics<arbitrary>], iteration_bounds = array<i64: 1, 1, 1>, scalar_prefetch = 0 : i64, scratch_operands = 0 : i64, tpu.core_type = #tpu.core_type<tc>, window_params = [{transform_indices = @transform_0, window_bounds = array<i64: 8, 128>}, {transform_indices = @transform_1, window_bounds = array<i64: 128, 128>}, {transform_indices = @transform_2, window_bounds = array<i64: 1, 128>}, {transform_indices = @transform_3, window_bounds = array<i64: 8, 128>}]} {
    %c0_i32 = arith.constant 0 : i32
    %0 = arith.cmpi eq, %arg2, %c0_i32 : i32
    %1 = arith.extui %0 : i1 to i32
    %c0_i32_0 = arith.constant 0 : i32
    %2 = arith.cmpi ne, %1, %c0_i32_0 : i32
    scf.if %2 {
      %c0_8 = arith.constant 0 : index
      %c0_9 = arith.constant 0 : index
      %9 = vector.load %arg5[%c0_8, %c0_9] : memref<1x128xf32, #tpu.memory_space<vmem>>, vector<1x128xf32>
      %10 = vector.shape_cast %9 : vector<1x128xf32> to vector<1x128xf32>
      %11 = vector.broadcast %10 : vector<1x128xf32> to vector<8x128xf32>
      %c0_10 = arith.constant 0 : index
      %c0_11 = arith.constant 0 : index
      %12 = vector.load %arg6[%c0_10, %c0_11] : memref<8x128xf32, #tpu.memory_space<vmem>>, vector<8x128xf32>
      tpu.vector_store %arg6[%c0_10, %c0_11], %11 {strides = array<i32>} : memref<8x128xf32, #tpu.memory_space<vmem>>, vector<8x128xf32>,
    } else {
    }
    %c0 = arith.constant 0 : index
    %c0_1 = arith.constant 0 : index
    %3 = vector.load %arg6[%c0, %c0_1] : memref<8x128xf32, #tpu.memory_space<vmem>>, vector<8x128xf32>
    %c0_2 = arith.constant 0 : index
    %c0_3 = arith.constant 0 : index
    %4 = vector.load %arg3[%c0_2, %c0_3] : memref<8x128xf32, #tpu.memory_space<vmem>>, vector<8x128xf32>
    %c0_4 = arith.constant 0 : index
    %c0_5 = arith.constant 0 : index
    %5 = vector.load %arg4[%c0_4, %c0_5] : memref<128x128xf32, #tpu.memory_space<vmem>>, vector<128x128xf32>
    %cst = arith.constant dense<0.000000e+00> : vector<8x128xf32>
    %6 = tpu.matmul %4, %5, %cst {dimension_numbers = #tpu.dot_dimension_numbers<[1], [0], [0], [1], [0, 0, 1, 1], [], []>} : vector<8x128xf32>, vector<128x128xf32>, vector<8x128xf32> -> vector<8x128xf32>
    %7 = arith.addf %3, %6 : vector<8x128xf32>
    %c0_6 = arith.constant 0 : index
    %c0_7 = arith.constant 0 : index
    %8 = vector.load %arg6[%c0_6, %c0_7] : memref<8x128xf32, #tpu.memory_space<vmem>>, vector<8x128xf32>
    tpu.vector_store %arg6[%c0_6, %c0_7], %7 {strides = array<i32>} : memref<8x128xf32, #tpu.memory_space<vmem>>, vector<8x128xf32>,
    return
  }
  func.func @transform_0(%arg0: i32, %arg1: i32, %arg2: i32) -> (i32, i32) {
    %c0_i32 = arith.constant 0 : i32
    return %arg0, %arg2 : i32, i32
  }
  func.func @transform_1(%arg0: i32, %arg1: i32, %arg2: i32) -> (i32, i32) {
    %c0_i32 = arith.constant 0 : i32
    return %arg2, %arg1 : i32, i32
  }
  func.func @transform_2(%arg0: i32, %arg1: i32, %arg2: i32) -> (i32, i32) {
    %c0_i32 = arith.constant 0 : i32
    %c0_i32_0 = arith.constant 0 : i32
    return %c0_i32, %arg1 : i32, i32
  }
  func.func @transform_3(%arg0: i32, %arg1: i32, %arg2: i32) -> (i32, i32) {
    %c0_i32 = arith.constant 0 : i32
    return %arg0, %arg1 : i32, i32
  }
}

</mosaic_0001>

<bundles_post_ra>
// kernel: tpu_custom_call.1
= control target key start
LH: loop header
LB: loop body
LE: loop exit
PB: predicated region body
PF: predicated region fallthrough
CT: control target
= control target key end

     0   :  { %8 = vsyncpa [#allocation3], 0  ;;  %s233_s0 = inlined_call_operand.hbm [shape: f32[8,128], index: 0, kind: input, shape index: {}]   ;;  %s234_s1 = inlined_call_operand.hbm [shape: f32[128,128], index: 1, kind: input, shape index: {}]   ;;  %s235_s2 = inlined_call_operand.vmem [shape: f32[1,128], index: 2, kind: input, shape index: {}]   ;;  %s236_s3 = inlined_call_operand.hbm [shape: f32[8,128], index: 3, kind: output, shape index: {}]  }
   0x1   :  { %9 = vsyncpa [#allocation6], 0 }
   0x2   :  { %10 = vsyncpa [#allocation4], 0  ;;  %s16_s14 = sshll.u32 %s233_s0, 4  ;;  %s196_s15 = smov [#allocation2]   ;;  %s17_s14 = int_to_ptr.hbm [resolvable:$true] %s16_s14 }
   0x3   :  { %s18_s16 = sshll.u32 %s196_s15, 4  ;;  %s26_s19 = sshll.u32 %s234_s1, 4  ;;  %s19_s16 = int_to_ptr.vmem [resolvable:$true] %s18_s16  ;;  %s27_s19 = int_to_ptr.hbm [resolvable:$true] %s26_s19 }
   0x4   :  { %21 = dma.hbm_to_vmem [thread:$0]  %s17_s14, 128, %s19_s16, [#allocation3]  }
   0x5   :  { %s197_s20 = smov [#allocation5]   ;;  %s198_s22 = smov 128  }
   0x6   :  { %s28_s21 = sshll.u32 %s197_s20, 4  ;;  %s199_s23 = smov 8   ;;  %s29_s21 = int_to_ptr.vmem [resolvable:$true] %s28_s21 }
   0x7   :  { %34 = dma.hbm_to_vmem [thread:$0]  %s27_s19, 2048, %s29_s21, [#allocation6], %s198_s22, %s198_s22, %s199_s23  }
   0x8   :  { %190 = dma.done.wait [#allocation3], 128  }
   0x9   :  { %191 = vsyncadd [#allocation3], 4294967168 }
   0xa   :  { %192 = dma.done.wait [#allocation6], 2048  }
   0xb   :  { %193 = vsyncadd [#allocation6], 4294965248  ;;  %v71_v0 = vld [vmem:[#allocation5 + $0x78] sm:$0xff]  ;;  %v70_v1 = vld [vmem:[#allocation5 + $0x70] sm:$0xff]  ;;  %s200_s24 = smov [#allocation7]   ;;  %s101_s28 = sshll.u32 %s236_s3, 4  ;;  %s102_s28 = int_to_ptr.hbm [resolvable:$true] %s101_s28 }
   0xc   :  { %72 = vmatpush.msra.mxu0 %v71_v0  ;;  %v69_v2 = vld [vmem:[#allocation5 + $0x68] sm:$0xff]  ;;  %v68_v3 = vld [vmem:[#allocation5 + $0x60] sm:$0xff]  ;;  %v67_v4 = vld [vmem:[#allocation5 + $0x58] sm:$0xff]  ;;  %s99_s25 = sshll.u32 %s200_s24, 4  ;;  %s100_s25 = int_to_ptr.vmem [resolvable:$true] %s99_s25 }
   0xd   :  { %v66_v5 = vld [vmem:[#allocation5 + $0x50] sm:$0xff]  ;;  %v65_v6 = vld [vmem:[#allocation5 + $0x48] sm:$0xff]  ;;  %v64_v7 = vld [vmem:[#allocation5 + $0x40] sm:$0xff] }
   0xe   :  { %73 = vmatpush.msra.mxu0 %v70_v1  ;;  %v63_v8 = vld [vmem:[#allocation5 + $0x38] sm:$0xff]  ;;  %v62_v9 = vld [vmem:[#allocation5 + $0x30] sm:$0xff]  ;;  %v61_v10 = vld [vmem:[#allocation5 + $0x28] sm:$0xff] }
   0xf   :  { %v60_v11 = vld [vmem:[#allocation5 + $0x20] sm:$0xff]  ;;  %v59_v12 = vld [vmem:[#allocation5 + $0x18] sm:$0xff]  ;;  %v58_v13 = vld [vmem:[#allocation5 + $0x10] sm:$0xff] }
  0x10   :  { %74 = vmatpush.msra.mxu0 %v69_v2  ;;  %v57_v14 = vld [vmem:[#allocation5 + $0x8] sm:$0xff]  ;;  %v56_v15 = vld [vmem:[#allocation5] sm:$0xff]  ;;  %v55_v16 = vld [vmem:[#allocation2] sm:$0xff] }
  0x11   :  { %v117_v17 = vld [vmem:[%s235_s2] ss:$0 sm:$0xff] }
  0x12   :  { %75 = vmatpush.msra.mxu0 %v68_v3 }
  0x14   :  { %76 = vmatpush.msra.mxu0 %v67_v4 }
  0x16   :  { %77 = vmatpush.msra.mxu0 %v66_v5 }
  0x18   :  { %78 = vmatpush.msra.mxu0 %v65_v6 }
  0x1a   :  { %79 = vmatpush.msra.mxu0 %v64_v7 }
  0x1c   :  { %80 = vmatpush.msra.mxu0 %v63_v8 }
  0x1e   :  { %81 = vmatpush.msra.mxu0 %v62_v9 }
  0x20   :  { %82 = vmatpush.msra.mxu0 %v61_v10 }
  0x22   :  { %83 = vmatpush.msra.mxu0 %v60_v11 }
  0x24   :  { %84 = vmatpush.msra.mxu0 %v59_v12 }
  0x26   :  { %85 = vmatpush.msra.mxu0 %v58_v13 }
  0x28   :  { %86 = vmatpush.msra.mxu0 %v57_v14 }
  0x2a   :  { %87 = vmatpush.msra.mxu0 %v56_v15 }
  0x2b   :  { %88 = vmatmul.f32.vlgmr.msra.gmra.mxu0 %v55_v16 }
  0xa8   :  { %v89_v18 = vpop.f32.mrf.mxu0 }
  0xa9   :  { %v92_v19 = vadd.f32 %v117_v17, %v89_v18 }
  0xab   :  { %93 = vst [vmem:[#allocation7] sm:$0xff] %v92_v19 }
  0xac   :  { %104 = dma.vmem_to_hbm [thread:$0]  %s100_s25, 128, %s102_s28, [#allocation4]  }
  0xad   :  { %194 = dma.done.wait [#allocation4], 128  }
  0xae   :  { %195 = vsyncadd [#allocation4], 4294967168 }
  0xaf   :  { %109 = vsyncpa [#allocation3], 1 }
  0xb0   :  { %110 = vsyncpa [#allocation6], 1 }
  0xb1   :  { %111 = vsyncpa [#allocation4], 1 }

</bundles_post_ra>
